<compile_context>
chip_gen: v7x
topology: tpu7x:2x2x1
jax: 0.10.0
libtpu: 0.0.40
codegen_flags: <defaults>
</compile_context>

<pallas_src>
import jax
import jax.numpy as jnp
from jax.experimental import pallas as pl
from jax.experimental.pallas import tpu as pltpu

HIDDEN = 256
LANES = 128  # TPU lane width; output columns padded to a multiple of this.


def _round_up(x, m):
    return (x + m - 1) // m * m


def _make_actor_kernel(compute_dtype, with_affine):
    """Build the kernel body; affine (scale/bias) specialized at trace time."""

    def kernel(*refs):
        if with_affine:
            (state_ref, w1_ref, b1_ref, w2_ref, b2_ref, w3_ref, b3_ref,
             scale_ref, bias_ref, out_ref) = refs
        else:
            (state_ref, w1_ref, b1_ref, w2_ref, b2_ref, w3_ref, b3_ref,
             out_ref) = refs

        x = state_ref[...].astype(compute_dtype)                   # (TB, S)

        # Layer 1: Linear(state_dim -> 256) + ReLU   (MXU, f32 accumulation)
        h1 = jnp.dot(x, w1_ref[...], preferred_element_type=jnp.float32)
        h1 = jnp.maximum(h1 + b1_ref[...], 0.0)

        # Layer 2: Linear(256 -> 256) + ReLU
        h2 = jnp.dot(h1.astype(compute_dtype), w2_ref[...],
                     preferred_element_type=jnp.float32)
        h2 = jnp.maximum(h2 + b2_ref[...], 0.0)

        # Layer 3: Linear(256 -> A_pad) + tanh (columns >= action_dim are 0-pad)
        h3 = jnp.dot(h2.astype(compute_dtype), w3_ref[...],
                     preferred_element_type=jnp.float32)
        a = jnp.tanh(h3 + b3_ref[...])

        if with_affine:
            a = scale_ref[...] * a + bias_ref[...]

        out_ref[...] = a                                           # lane-dense

    return kernel


def actor_forward(state, params, *, action_scale=None, action_bias=None,
                  tb=512, compute_dtype=jnp.bfloat16):
    """Actor forward via one batch-tiled pallas_call.

    params = (w1, b1, w2, b2, w3, b3); weights are (in, out), biases (1, out).
    action_scale/action_bias of None reproduces the action_space=None branch
    (scale=1, bias=0) with no in-kernel affine.
    """
    w1, b1, w2, b2, w3, b3 = params
    B, S = state.shape
    A = w3.shape[1]
    A_pad = _round_up(A, LANES)

    # Cast weights once outside the kernel; pad layer-3 columns to 128 lanes.
    w1c = w1.astype(compute_dtype)
    w2c = w2.astype(compute_dtype)
    w3c = jnp.zeros((HIDDEN, A_pad), compute_dtype).at[:, :A].set(
        w3.astype(compute_dtype))
    b3p = jnp.zeros((1, A_pad), jnp.float32).at[:, :A].set(
        b3.astype(jnp.float32))

    # Batch tiling: TB a multiple of 8 sublanes; pad B up to a tile multiple.
    tb = max(8, min(_round_up(tb, 8), _round_up(B, 8)))
    B_pad = _round_up(B, tb)
    if B_pad != B:
        state = jnp.zeros((B_pad, S), state.dtype).at[:B].set(state)

    with_affine = action_scale is not None
    operands = [state, w1c, b1, w2c, b2, w3c, b3p]

    row = lambda i: (i, 0)     # batch-tiled arrays
    const = lambda i: (0, 0)   # weights: resident in VMEM across the grid

    in_specs = [
        pl.BlockSpec((tb, S), row),
        pl.BlockSpec((S, HIDDEN), const),
        pl.BlockSpec((1, HIDDEN), const),
        pl.BlockSpec((HIDDEN, HIDDEN), const),
        pl.BlockSpec((1, HIDDEN), const),
        pl.BlockSpec((HIDDEN, A_pad), const),
        pl.BlockSpec((1, A_pad), const),
    ]
    if with_affine:
        scale_p = jnp.zeros((1, A_pad), jnp.float32).at[:, :A].set(
            jnp.broadcast_to(jnp.asarray(action_scale, jnp.float32), (A,)))
        bias_p = jnp.zeros((1, A_pad), jnp.float32).at[:, :A].set(
            jnp.broadcast_to(jnp.asarray(action_bias, jnp.float32), (A,)))
        operands += [scale_p, bias_p]
        in_specs += [pl.BlockSpec((1, A_pad), const),
                     pl.BlockSpec((1, A_pad), const)]

    out_padded = pl.pallas_call(
        _make_actor_kernel(compute_dtype, with_affine),
        out_shape=jax.ShapeDtypeStruct((B_pad, A_pad), jnp.float32),
        grid=(pl.cdiv(B_pad, tb),),
        in_specs=in_specs,
        out_specs=pl.BlockSpec((tb, A_pad), row),
        compiler_params=pltpu.CompilerParams(
            dimension_semantics=("parallel",)),
    )(*operands)

    return out_padded[:B, :A]


def init_actor_params(key, state_dim, action_dim):
    """Deterministic init mimicking PyTorch nn.Linear (U[-1/sqrt(fan_in), +])."""
    def linear(k, fan_in, fan_out):
        kw, kb = jax.random.split(k)
        bound = 1.0 / jnp.sqrt(jnp.float32(fan_in))
        w = jax.random.uniform(kw, (fan_in, fan_out), jnp.float32, -bound, bound)
        b = jax.random.uniform(kb, (1, fan_out), jnp.float32, -bound, bound)
        return w, b

    k1, k2, k3 = jax.random.split(key, 3)
    w1, b1 = linear(k1, state_dim, HIDDEN)
    w2, b2 = linear(k2, HIDDEN, HIDDEN)
    w3, b3 = linear(k3, HIDDEN, action_dim)
    return (w1, b1, w2, b2, w3, b3)


def actor_reference(state, params, action_scale=None, action_bias=None):
    """Pure-JAX reference for correctness checks."""
    w1, b1, w2, b2, w3, b3 = params
    x = jnp.maximum(state @ w1 + b1, 0.0)
    x = jnp.maximum(x @ w2 + b2, 0.0)
    a = jnp.tanh(x @ w3 + b3)
    if action_scale is not None:
        a = jnp.asarray(action_scale, jnp.float32) * a + \
            jnp.asarray(action_bias, jnp.float32)
    return a


if __name__ == "__main__":
    key = jax.random.PRNGKey(0)
    k_params, k_state = jax.random.split(key)

    state_dim, action_dim, batch = 16, 8, 64
    params = init_actor_params(k_params, state_dim, action_dim)
    state = jax.random.normal(k_state, (batch, state_dim), jnp.float32)

    ref = actor_reference(state, params)

    # Default DDPG path (action_space=None -> no affine), bf16 MXU operands.
    # tb=16 forces a 4-step batch grid so tiling/padding is actually exercised.
    out_bf16 = jax.block_until_ready(
        actor_forward(state, params, tb=16, compute_dtype=jnp.bfloat16))
    assert out_bf16.shape == (batch, action_dim)
    assert jnp.allclose(out_bf16, ref, atol=5e-2, rtol=5e-2), \
        "bf16 kernel mismatch vs JAX reference"

    # Full-f32 MXU path (tight tolerance check).
    out_f32 = jax.block_until_ready(
        actor_forward(state, params, tb=16, compute_dtype=jnp.float32))
    assert jnp.allclose(out_f32, ref, atol=1e-4, rtol=1e-4), \
        "f32 kernel mismatch vs JAX reference"

    # action_space path: per-action scale/bias folded into the kernel.
    low = -2.0 * jnp.ones((action_dim,), jnp.float32)
    high = jnp.linspace(1.0, 3.0, action_dim, dtype=jnp.float32)
    scale = (high - low) / 2.0
    bias = (high + low) / 2.0
    out_aff = jax.block_until_ready(
        actor_forward(state, params, action_scale=scale, action_bias=bias,
                      tb=16, compute_dtype=jnp.float32))
    ref_aff = actor_reference(state, params, scale, bias)
    assert jnp.allclose(out_aff, ref_aff, atol=1e-4, rtol=1e-4), \
        "affine kernel mismatch vs JAX reference"

    print("KERNEL_OK")
</pallas_src>

<mosaic_0001>
module attributes {stable_mosaic.version = 11 : i64} {
  func.func @kernel(%arg0: i32, %arg1: memref<16x16xf32, #tpu.memory_space<vmem>>, %arg2: memref<16x256xbf16, #tpu.memory_space<vmem>>, %arg3: memref<1x256xf32, #tpu.memory_space<vmem>>, %arg4: memref<256x256xbf16, #tpu.memory_space<vmem>>, %arg5: memref<1x256xf32, #tpu.memory_space<vmem>>, %arg6: memref<256x128xbf16, #tpu.memory_space<vmem>>, %arg7: memref<1x128xf32, #tpu.memory_space<vmem>>, %arg8: memref<16x128xf32, #tpu.memory_space<vmem>>) attributes {dimension_semantics = [#tpu.dimension_semantics<parallel>], iteration_bounds = array<i64: 4>, scalar_prefetch = 0 : i64, scratch_operands = 0 : i64, tpu.core_type = #tpu.core_type<tc>, window_params = [{transform_indices = @transform_0, window_bounds = array<i64: 16, 16>}, {pipeline_mode = #tpu.pipeline_mode<synchronous>, transform_indices = @transform_1, window_bounds = array<i64: 16, 256>}, {pipeline_mode = #tpu.pipeline_mode<synchronous>, transform_indices = @transform_2, window_bounds = array<i64: 1, 256>}, {pipeline_mode = #tpu.pipeline_mode<synchronous>, transform_indices = @transform_3, window_bounds = array<i64: 256, 256>}, {pipeline_mode = #tpu.pipeline_mode<synchronous>, transform_indices = @transform_4, window_bounds = array<i64: 1, 256>}, {pipeline_mode = #tpu.pipeline_mode<synchronous>, transform_indices = @transform_5, window_bounds = array<i64: 256, 128>}, {pipeline_mode = #tpu.pipeline_mode<synchronous>, transform_indices = @transform_6, window_bounds = array<i64: 1, 128>}, {transform_indices = @transform_7, window_bounds = array<i64: 16, 128>}]} {
    %c0 = arith.constant 0 : index
    %c0_0 = arith.constant 0 : index
    %0 = vector.load %arg1[%c0, %c0_0] : memref<16x16xf32, #tpu.memory_space<vmem>>, vector<16x16xf32>
    %1 = arith.truncf %0 : vector<16x16xf32> to vector<16x16xbf16>
    %c0_1 = arith.constant 0 : index
    %c0_2 = arith.constant 0 : index
    %2 = vector.load %arg2[%c0_1, %c0_2] : memref<16x256xbf16, #tpu.memory_space<vmem>>, vector<16x256xbf16>
    %cst = arith.constant dense<0.000000e+00> : vector<16x256xf32>
    %3 = tpu.matmul %1, %2, %cst {dimension_numbers = #tpu.dot_dimension_numbers<[1], [0], [0], [1], [0, 0, 1, 1], [], []>} : vector<16x16xbf16>, vector<16x256xbf16>, vector<16x256xf32> -> vector<16x256xf32>
    %c0_3 = arith.constant 0 : index
    %c0_4 = arith.constant 0 : index
    %4 = vector.load %arg3[%c0_3, %c0_4] : memref<1x256xf32, #tpu.memory_space<vmem>>, vector<1x256xf32>
    %5 = vector.broadcast %4 : vector<1x256xf32> to vector<16x256xf32>
    %6 = arith.addf %3, %5 : vector<16x256xf32>
    %cst_5 = arith.constant 0.000000e+00 : f32
    %7 = vector.broadcast %cst_5 : f32 to vector<16x256xf32>
    %8 = arith.maximumf %6, %7 : vector<16x256xf32>
    %9 = arith.truncf %8 : vector<16x256xf32> to vector<16x256xbf16>
    %c0_6 = arith.constant 0 : index
    %c0_7 = arith.constant 0 : index
    %10 = vector.load %arg4[%c0_6, %c0_7] : memref<256x256xbf16, #tpu.memory_space<vmem>>, vector<256x256xbf16>
    %cst_8 = arith.constant dense<0.000000e+00> : vector<16x256xf32>
    %11 = tpu.matmul %9, %10, %cst_8 {dimension_numbers = #tpu.dot_dimension_numbers<[1], [0], [0], [1], [0, 0, 1, 1], [], []>} : vector<16x256xbf16>, vector<256x256xbf16>, vector<16x256xf32> -> vector<16x256xf32>
    %c0_9 = arith.constant 0 : index
    %c0_10 = arith.constant 0 : index
    %12 = vector.load %arg5[%c0_9, %c0_10] : memref<1x256xf32, #tpu.memory_space<vmem>>, vector<1x256xf32>
    %13 = vector.broadcast %12 : vector<1x256xf32> to vector<16x256xf32>
    %14 = arith.addf %11, %13 : vector<16x256xf32>
    %cst_11 = arith.constant 0.000000e+00 : f32
    %15 = vector.broadcast %cst_11 : f32 to vector<16x256xf32>
    %16 = arith.maximumf %14, %15 : vector<16x256xf32>
    %17 = arith.truncf %16 : vector<16x256xf32> to vector<16x256xbf16>
    %c0_12 = arith.constant 0 : index
    %c0_13 = arith.constant 0 : index
    %18 = vector.load %arg6[%c0_12, %c0_13] : memref<256x128xbf16, #tpu.memory_space<vmem>>, vector<256x128xbf16>
    %cst_14 = arith.constant dense<0.000000e+00> : vector<16x128xf32>
    %19 = tpu.matmul %17, %18, %cst_14 {dimension_numbers = #tpu.dot_dimension_numbers<[1], [0], [0], [1], [0, 0, 1, 1], [], []>} : vector<16x256xbf16>, vector<256x128xbf16>, vector<16x128xf32> -> vector<16x128xf32>
    %c0_15 = arith.constant 0 : index
    %c0_16 = arith.constant 0 : index
    %20 = vector.load %arg7[%c0_15, %c0_16] : memref<1x128xf32, #tpu.memory_space<vmem>>, vector<1x128xf32>
    %21 = vector.broadcast %20 : vector<1x128xf32> to vector<16x128xf32>
    %22 = arith.addf %19, %21 : vector<16x128xf32>
    %23 = math.tanh %22 : vector<16x128xf32>
    %c0_17 = arith.constant 0 : index
    %c0_18 = arith.constant 0 : index
    %24 = vector.load %arg8[%c0_17, %c0_18] : memref<16x128xf32, #tpu.memory_space<vmem>>, vector<16x128xf32>
    tpu.vector_store %arg8[%c0_17, %c0_18], %23 {strides = array<i32>} : memref<16x128xf32, #tpu.memory_space<vmem>>, vector<16x128xf32>,
    return
  }
  func.func @transform_0(%arg0: i32) -> (i32, i32) {
    %c0_i32 = arith.constant 0 : i32
    %c0_i32_0 = arith.constant 0 : i32
    return %arg0, %c0_i32 : i32, i32
  }
  func.func @transform_1(%arg0: i32) -> (i32, i32) {
    %c0_i32 = arith.constant 0 : i32
    %c0_i32_0 = arith.constant 0 : i32
    %c0_i32_1 = arith.constant 0 : i32
    return %c0_i32, %c0_i32_0 : i32, i32
  }
  func.func @transform_2(%arg0: i32) -> (i32, i32) {
    %c0_i32 = arith.constant 0 : i32
    %c0_i32_0 = arith.constant 0 : i32
    %c0_i32_1 = arith.constant 0 : i32
    return %c0_i32, %c0_i32_0 : i32, i32
  }
  func.func @transform_3(%arg0: i32) -> (i32, i32) {
    %c0_i32 = arith.constant 0 : i32
    %c0_i32_0 = arith.constant 0 : i32
    %c0_i32_1 = arith.constant 0 : i32
    return %c0_i32, %c0_i32_0 : i32, i32
  }
  func.func @transform_4(%arg0: i32) -> (i32, i32) {
    %c0_i32 = arith.constant 0 : i32
    %c0_i32_0 = arith.constant 0 : i32
    %c0_i32_1 = arith.constant 0 : i32
    return %c0_i32, %c0_i32_0 : i32, i32
  }
  func.func @transform_5(%arg0: i32) -> (i32, i32) {
    %c0_i32 = arith.constant 0 : i32
    %c0_i32_0 = arith.constant 0 : i32
    %c0_i32_1 = arith.constant 0 : i32
    return %c0_i32, %c0_i32_0 : i32, i32
  }
  func.func @transform_6(%arg0: i32) -> (i32, i32) {
    %c0_i32 = arith.constant 0 : i32
    %c0_i32_0 = arith.constant 0 : i32
    %c0_i32_1 = arith.constant 0 : i32
    return %c0_i32, %c0_i32_0 : i32, i32
  }
  func.func @transform_7(%arg0: i32) -> (i32, i32) {
    %c0_i32 = arith.constant 0 : i32
    %c0_i32_0 = arith.constant 0 : i32
    return %arg0, %c0_i32 : i32, i32
  }
}

</mosaic_0001>

<bundles_post_ra>
// kernel: tpu_custom_call.1
= control target key start
LH: loop header
LB: loop body
LE: loop exit
PB: predicated region body
PF: predicated region fallthrough
CT: control target
= control target key end

     0   :  { %12 = vsyncpa [#allocation3], 0  ;;  %s1518_s0 = inlined_call_operand.vmem [shape: f32[64,16], index: 0, kind: input, shape index: {}]   ;;  %s1519_s1 = inlined_call_operand.vmem [shape: bf16[16,256], index: 1, kind: input, shape index: {}]   ;;  %s1520_s2 = inlined_call_operand.vmem [shape: f32[1,256], index: 2, kind: input, shape index: {}]   ;;  %s1521_s3 = inlined_call_operand.hbm [shape: bf16[256,256], index: 3, kind: input, shape index: {}]   ;;  %s1522_s4 = inlined_call_operand.vmem [shape: f32[1,256], index: 4, kind: input, shape index: {}]   ;;  %s1523_s5 = inlined_call_operand.hbm [shape: bf16[256,128], index: 5, kind: input, shape index: {}]   ;;  %s1524_s6 = inlined_call_operand.vmem [shape: f32[1,128], index: 6, kind: input, shape index: {}]   ;;  %s1525_s7 = inlined_call_operand.hbm [shape: f32[64,128], index: 7, kind: output, shape index: {}]  }
   0x1   :  { %13 = vsyncpa [#allocation6], 0 }
   0x2   :  { %14 = vsyncpa [#allocation4], 0 }
   0x3   :  { %16 = vsyncpa [#allocation4 + $0x1], 0  ;;  %s1329_s24 = smov 0   ;;  %s1331_s25 = smov 0  }
   0x4   :  { %s1333_s26 = smov 0   ;;  %s1335_s27 = smov 0  }
   0x5 LB: > { %s1350_s28 = sadd.s32 4294967295, %s1277_s27   ;;  %s922_s29 = sadd.s32 4294967294, %s1277_s27   ;;  %s1277_s27 = sphi %s1335_s27, %s1545_s27   ;;  %s1273_s26 = sphi %s1333_s26, %s1544_s26   ;;  %s1269_s25 = sphi %s1331_s25, %s1543_s25   ;;  %s1265_s24 = sphi %s1329_s24, %s1542_s24  }
   0x6   : > { %s1354_s30 = sadd.s32 1, %s1277_s27   ;;  %s181_s8 = sadd.s32 1, %s1273_s26 }
   0x7   : > { %s178_s9 = ssub.s32 %s1277_s27, %s1354_s30  ;;  %p191_p0 = scmp.ne.s32.totalorder %s1273_s26, %s1269_s25 }
   0x8   : > { %p179_p1 = scmp.eq.s32.totalorder %s178_s9, 0  ;;  %p192_p2 = scmp.eq.s32.totalorder %s1350_s28, 3 }
   0x9   : > { %p197_p3 = scmp.ne.s32.totalorder %s1269_s25, %s1265_s24  ;;  %p198_p4 = scmp.eq.s32.totalorder %s922_s29, 3 }
   0xa   : > { %s1365_s10 = scalar_select %p179_p1, %s1273_s26, %s181_s8  }
   0xb   : > { %p1367_p5 = por %p192_p2, %p191_p0  ;;  %p1371_p6 = por %p198_p4, %p197_p3 }
   0xc   : > { %1529 = sst [smem:[#allocation11_spill]] %s1365_s10  ;;  %p923_p7 = scmp.ge.s32.totalorder %s1277_s27, 1 }
   0xd   : > { %s1530_s11 = scalar_select %p1367_p5, 1, 0 }
   0xe   : > { %s1531_s12 = scalar_select %p1371_p6, 1, 0 }
   0xf   : > { %p205_p8 = scmp.lt.s32.totalorder %s1277_s27, 5  ;;  %p1526_p9 = scmp.eq.s32.totalorder %s1350_s28, 0 }
  0x10   : > { %s1279_s14 = smov [#allocation2]   ;;  %s1280_s17 = smov [#allocation5]  }
  0x11   : > { %p1378_p10 = pnand %p923_p7, %p205_p8  ;;  %s223_s15 = sshll.u32 %s1279_s14, 4  ;;  %s224_s15 = int_to_ptr.vmem [resolvable:$true] %s223_s15 }
  0x12   : > { %s239_s18 = sshll.u32 %s1280_s17, 4  ;;  %s1151_s21 = scalar_lea.hbm %s1521_s3, 4096  ;;  %s1390_s18 = int_to_ptr.vmem [resolvable:$true] %s239_s18 }
  0x13   : > { %s1532_s13 = scalar_select %p1378_p10, 1, 0 }
  0x14   : > { %p1023_p11 = pneg %p1378_p10  ;;  %p1152_p13 = scmp.ne.s32.totalorder %s1521_s3, %s1151_s21 }
  0x15   : > { %p1158_p3 = scmp.lt.u32.totalorder %s1151_s21, %s1521_s3 }
  0x16   : > { %p1386_p12 = pnand %p1526_p9, %p1023_p11 }
  0x18   : > { %p1153_p0 = pneg %p1386_p12 }
  0x1a   : > { %p1154_p1 = pnand %p1153_p0, %p1152_p13 }
  0x1c   : > { %p1155_p2 = pneg %p1154_p1 }
  0x1e   : > { %p1160_p4 = pnand %p1158_p3, %p1155_p2 }
  0x20   : > { %1163 = shalt.err (!%p1160_p4)
}
  0x21   : > { %s1164_s9 = scalar_lea.vmem %s224_s15, 4096  ;;  %p1172_p9 = scmp.lt.s32.totalorder %s224_s15, %s224_s15 }
  0x22   : > { %p1165_p7 = scmp.ne.s32.totalorder %s224_s15, %s1164_s9  ;;  %p1173_p6 = scmp.lt.s32.totalorder %s1164_s9, %s1164_s9 }
  0x24   : > { %p1167_p8 = pnand %p1165_p7, %p1153_p0  ;;  %p1174_p5 = por %p1173_p6, %p1172_p9 }
  0x26   : > { %p1168_p11 = pneg %p1167_p8 }
  0x28   : > { %p1175_p10 = pnand %p1174_p5, %p1168_p11 }
  0x2a   : > { %1178 = shalt.err (!%p1175_p10)
}
  0x2b   : > { %s1281_s14 = smov 128   ;;  %s1282_s17 = smov 8  }
  0x2c   : > { %1026 = dma.hbm_to_vmem [thread:$0]  (!%p1386_p12), %s1521_s3, 4096, %s224_s15, [#allocation3], %s1281_s14, %s1281_s14, %s1282_s17  }
  0x2d   : > { %s1179_s23 = scalar_lea.hbm %s1523_s5, 2048 }
  0x2e   : > { %p1180_p13 = scmp.ne.s32.totalorder %s1523_s5, %s1179_s23  ;;  %p1186_p9 = scmp.lt.u32.totalorder %s1179_s23, %s1523_s5 }
  0x30   : > { %p1182_p5 = pnand %p1180_p13, %p1153_p0 }
  0x32   : > { %p1183_p6 = pneg %p1182_p5 }
  0x34   : > { %p1188_p10 = pnand %p1186_p9, %p1183_p6 }
  0x36   : > { %1191 = shalt.err (!%p1188_p10)
}
  0x37   : > { %s1192_s15 = scalar_lea.vmem %s1390_s18, 2048  ;;  %p1200_p4 = scmp.lt.s32.totalorder %s1390_s18, %s1390_s18 }
  0x38   : > { %p1193_p1 = scmp.ne.s32.totalorder %s1390_s18, %s1192_s15  ;;  %p1201_p7 = scmp.lt.s32.totalorder %s1192_s15, %s1192_s15 }
  0x3a   : > { %p1195_p2 = pnand %p1193_p1, %p1153_p0  ;;  %p1202_p8 = por %p1201_p7, %p1200_p4 }
  0x3c   : > { %p1196_p3 = pneg %p1195_p2 }
  0x3e   : > { %p1203_p11 = pnand %p1202_p8, %p1196_p3 }
  0x40   : > { %1206 = shalt.err (!%p1203_p11)
}
  0x41   : > { %s1283_s10 = smov 64   ;;  %s1284_s14 = smov 4  }
  0x42   : > { %1029 = dma.hbm_to_vmem [thread:$0]  (!%p1386_p12), %s1523_s5, 2048, %s1390_s18, [#allocation6], %s1283_s10, %s1283_s10, %s1284_s14  }
  0x43   : > { %p1534_p13 = scmp.ne.s32.totalorder %s1532_s13, 0 }
  0x44   : > { %p1535_p0 = scmp.eq.s32.totalorder (!%p1534_p13), %s1350_s28, 0 }
  0x45   : > { %267 = sbr.rel (%p1534_p13) target bundleno = 778 (0x30a), region = 48 }
  0x4c   : > { %1252 = dma.done.wait (%p1535_p0), [#allocation3], 4096   ;;  %p1536_p5 = pmov %p1535_p0 }
  0x4d   : > { %p1537_p6 = pmov %p1535_p0 }
  0x4e   : > { %1254 = vsyncadd (%p1536_p5), [#allocation3], 4294963200 }
  0x4f   : > { %1256 = dma.done.wait (%p1537_p6), [#allocation6], 2048   ;;  %p1538_p9 = pmov %p1535_p0 }
  0x50   : > { %s931_s16 = sshll.u32 %s1350_s28, 1  ;;  %v1285_v0 = vmov 0   ;;  %v1080_v1 = vld [vmem:[%s1519_s1 + $0x4] ss:$8 sps:$4 sm:$0xff]   ;;  %v1082_v2 = vld [vmem:[%s1519_s1] ss:$8 sps:$4 sm:$0xff]   ;;  %v318_v49 = vlaneseq }
  0x51   : > { %1258 = vsyncadd (%p1538_p9), [#allocation6], 4294965248  ;;  %374 = vmatprep.mubr.bf16.mxu0 %v1285_v0  ;;  %p304_p12 = scmp.lt.s32.totalorder %s931_s16, 7  ;;  %342 = vmatprep.subr.bf16.mxu0 %v1080_v1  ;;  %v1083_v6 = vld [vmem:[#allocation2 + $0x4] ss:$8 sps:$4 sm:$0xff]   ;;  %vm338_vm0 = vcmask 130048  }
  0x52   : > { %343 = vmatpush1.bf16.msra.mxu0 %v1082_v2  ;;  %v1085_v7 = vld [vmem:[#allocation2] ss:$8 sps:$4 sm:$0xff]   ;;  %595 = vmatprep.subr.bf16.mxu1 %v1083_v6  ;;  %v1086_v8 = vld [vmem:[#allocation2 + $0x14] ss:$8 sps:$4 sm:$0xff]   ;;  %v1088_v9 = vld [vmem:[#allocation2 + $0x10] ss:$8 sps:$4 sm:$0xff]  }
  0x53   : > { %s1547_s16 = smov (!%p304_p12, %s931_s16), 7  ;;  %596 = vmatpush1.bf16.msra.mxu1 %v1085_v7  ;;  %v1089_v10 = vld [vmem:[#allocation2 + $0x24] ss:$8 sps:$4 sm:$0xff]   ;;  %v1091_v11 = vld [vmem:[#allocation2 + $0x20] ss:$8 sps:$4 sm:$0xff]   ;;  %v1135_v42 = vld [vmem:[#allocation5 + $0x50] sm:$0xff]  }
  0x54   : > { %s932_s13 = sshll.u32 %s1547_s16, 3  ;;  %597 = vmatprep.subr.bf16.mxu1 %v1086_v8  ;;  %v1092_v12 = vld [vmem:[#allocation2 + $0x34] ss:$8 sps:$4 sm:$0xff]   ;;  %v1094_v13 = vld [vmem:[#allocation2 + $0x30] ss:$8 sps:$4 sm:$0xff]   ;;  %v1131_v38 = vld [vmem:[#allocation5 + $0x40] sm:$0xff]  }
  0x55   : > { %s307_s21 = scalar_lea.vmem %s1518_s0, %s932_s13  ;;  %v1095_v14 = vld [vmem:[#allocation2 + $0x44] ss:$8 sps:$4 sm:$0xff]   ;;  %v1097_v15 = vld [vmem:[#allocation2 + $0x40] ss:$8 sps:$4 sm:$0xff]   ;;  %v1098_v16 = vld [vmem:[#allocation2 + $0x54] ss:$8 sps:$4 sm:$0xff]   ;;  %991 = vmatprep.subr.bf16.mxu0 %v1131_v38 }
  0x56   : > { %v311_v3 = vld [vmem:[%s307_s21] sm:$0xff]  ;;  %v312_v4 = vld [vmem:[%s307_s21 + $0x8] sm:$0xff]  ;;  %v1100_v17 = vld [vmem:[#allocation2 + $0x50] ss:$8 sps:$4 sm:$0xff]   ;;  %v319_v50 = vshrl.u32 %v318_v49, 7  ;;  %s300_s16 = sand.u32 1, %s1269_s25  }
  0x57   : > { %v313_v5 = vpack.c.bf16 %v312_v4, %v311_v3  ;;  %598 = vmatpush1.bf16.msra.mxu1 %v1088_v9  ;;  %v1101_v18 = vld [vmem:[#allocation2 + $0x64] ss:$8 sps:$4 sm:$0xff]   ;;  %v1103_v19 = vld [vmem:[#allocation2 + $0x60] ss:$8 sps:$4 sm:$0xff]   ;;  %v1104_v20 = vld [vmem:[#allocation2 + $0x74] ss:$8 sps:$4 sm:$0xff]  }
  0x58   : > { %599 = vmatprep.subr.bf16.mxu1 %v1089_v10  ;;  %v1106_v21 = vld [vmem:[#allocation2 + $0x70] ss:$8 sps:$4 sm:$0xff]   ;;  %v1107_v22 = vld [vmem:[#allocation2 + $0x84] ss:$8 sps:$4 sm:$0xff]   ;;  %v1109_v23 = vld [vmem:[#allocation2 + $0x80] ss:$8 sps:$4 sm:$0xff]  }
  0x59   : > { %935 = vmatmul.mubr.msk.bf16.vlgmr.msra.gmra.mrb[0].mxu0 %vm338_vm0, %v313_v5  ;;  %v1110_v24 = vld [vmem:[#allocation2 + $0x94] ss:$8 sps:$4 sm:$0xff]   ;;  %v1112_v25 = vld [vmem:[#allocation2 + $0x90] ss:$8 sps:$4 sm:$0xff]   ;;  %v1113_v26 = vld [vmem:[#allocation2 + $0xa4] ss:$8 sps:$4 sm:$0xff]  }
  0x5a   : > { %v1115_v27 = vld [vmem:[#allocation2 + $0xa0] ss:$8 sps:$4 sm:$0xff]   ;;  %v1116_v28 = vld [vmem:[#allocation2 + $0xb4] ss:$8 sps:$4 sm:$0xff]   ;;  %v1118_v29 = vld [vmem:[#allocation2 + $0xb0] ss:$8 sps:$4 sm:$0xff]  }
  0x5b   : > { %600 = vmatpush1.bf16.msra.mxu1 %v1091_v11  ;;  %v1119_v30 = vld [vmem:[#allocation2 + $0xc4] ss:$8 sps:$4 sm:$0xff]   ;;  %v1121_v31 = vld [vmem:[#allocation2 + $0xc0] ss:$8 sps:$4 sm:$0xff]   ;;  %v1122_v32 = vld [vmem:[#allocation2 + $0xd4] ss:$8 sps:$4 sm:$0xff]  }
  0x5c   : > { %601 = vmatprep.subr.bf16.mxu1 %v1092_v12  ;;  %v1124_v33 = vld [vmem:[#allocation2 + $0xd0] ss:$8 sps:$4 sm:$0xff]   ;;  %v1125_v34 = vld [vmem:[#allocation2 + $0xe4] ss:$8 sps:$4 sm:$0xff]   ;;  %v1127_v35 = vld [vmem:[#allocation2 + $0xe0] ss:$8 sps:$4 sm:$0xff]  }
  0x5d   : > { %v1128_v36 = vld [vmem:[#allocation2 + $0xf4] ss:$8 sps:$4 sm:$0xff]   ;;  %v1130_v37 = vld [vmem:[#allocation2 + $0xf0] ss:$8 sps:$4 sm:$0xff]   ;;  %v1132_v39 = vld [vmem:[#allocation5] sm:$0xff]   ;;  %v320_v51 = vsub.s32 0, %v319_v50 }
  0x5e   : > { %v1133_v40 = vld [vmem:[#allocation5 + $0x48] sm:$0xff]   ;;  %992 = vmatpush3.bf16.msra.mxu0 %v1132_v39  ;;  %v1136_v43 = vld [vmem:[#allocation5 + $0x10] sm:$0xff]   ;;  %v1137_v44 = vld [vmem:[#allocation5 + $0x58] sm:$0xff]   ;;  %v324_v53 = vsub.s32 1, %v319_v50  ;;  %s930_s13 = sshll.u32 %s300_s16, 4  ;;  %s990_s18 = sshll.u32 %s1350_s28, 8 }
  0x5f   : > { %602 = vmatpush1.bf16.msra.mxu1 %v1094_v13  ;;  %v1134_v41 = vld [vmem:[#allocation5 + $0x8] sm:$0xff]   ;;  %993 = vmatprep.subr.bf16.mxu0 %v1133_v40  ;;  %v1138_v45 = vld [vmem:[#allocation5 + $0x18] sm:$0xff]   ;;  %v1139_v46 = vld [vmem:[#allocation5 + $0x60] sm:$0xff]   ;;  %s302_s20 = scalar_lea.vmem [#allocation7], %s930_s13  ;;  %s1473_s29 = scalar_lea.hbm %s1525_s7, %s990_s18 }
  0x60   : > { %603 = vmatprep.subr.bf16.mxu1 %v1095_v14  ;;  %v1140_v47 = vld [vmem:[#allocation5 + $0x20] sm:$0xff]   ;;  %v1141_v48 = vld [vmem:[#allocation5 + $0x68] sm:$0xff]   ;;  %v1143_v7 = vld [vmem:[#allocation5 + $0x70] sm:$0xff]   ;;  %s838_s21 = sshll.u32 %s302_s20, 4  ;;  %s1477_s8 = scalar_lea.sflag [#allocation4], %s300_s16  ;;  %s1475_s21 = int_to_ptr.vmem [resolvable:$true] %s838_s21 }
  0x61   : > { %v316_v52 = vld [vmem:[%s1520_s2] sm:$0x3]  ;;  %v1142_v6 = vld [vmem:[#allocation5 + $0x28] sm:$0xff]   ;;  %v1144_v8 = vld [vmem:[#allocation5 + $0x30] sm:$0xff]   ;;  %s1207_s9 = scalar_lea.vmem %s1475_s21, 256  ;;  %p1539_p1 = scmp.ne.s32.totalorder %s1530_s11, 0 }
  0x62   : > { %994 = vmatpush3.bf16.msra.mxu0 %v1134_v41  ;;  %v321_v54 = vrot.slane %v316_v52, %v320_v51  ;;  %v325_v55 = vrot.slane %v316_v52, %v324_v53  ;;  %v1145_v9 = vld [vmem:[#allocation5 + $0x78] sm:$0xff]   ;;  %v423_v11 = vld [vmem:[%s1522_s4] sm:$0x3]  ;;  %p1208_p10 = scmp.ne.s32.totalorder %s1475_s21, %s1207_s9  ;;  %s1286_s28 = smov [#allocation7]  }
  0x63   : > { %604 = vmatpush1.bf16.msra.mxu1 %v1097_v15  ;;  %995 = vmatprep.subr.bf16.mxu0 %v1135_v42  ;;  %v1146_v10 = vld [vmem:[#allocation5 + $0x38] sm:$0xff]   ;;  %v428_v12 = vrot.slane %v423_v11, %v320_v51  ;;  %v432_v13 = vrot.slane %v423_v11, %v324_v53  ;;  %s1211_s15 = sshll.u32 %s1286_s28, 4  ;;  %s1212_s15 = int_to_ptr.vmem [resolvable:$false] %s1211_s15 }
  0x64   : > { %605 = vmatprep.subr.bf16.mxu1 %v1098_v16  ;;  %p1209_p2 = pnand %p1208_p10, %p1539_p1  ;;  %s1213_s10 = scalar_lea.vmem %s1212_s15, 512 }
  0x65   : > { %p1214_p4 = scmp.lt.s32.totalorder %s1475_s21, %s1212_s15  ;;  %p1215_p7 = scmp.lt.s32.totalorder %s1213_s10, %s1207_s9 }
  0x66   : > { %996 = vmatpush3.bf16.msra.mxu0 %v1136_v43  ;;  %p1210_p3 = pneg %p1209_p2 }
  0x67   : > { %606 = vmatpush1.bf16.msra.mxu1 %v1100_v17  ;;  %997 = vmatprep.subr.bf16.mxu0 %v1137_v44  ;;  %p1216_p8 = por %p1215_p7, %p1214_p4 }
  0x68   : > { %607 = vmatprep.subr.bf16.mxu1 %v1101_v18 }
  0x69   : > { %p1217_p11 = pnand %p1216_p8, %p1210_p3 }
  0x6a   : > { %998 = vmatpush3.bf16.msra.mxu0 %v1138_v45 }
  0x6b   : > { %608 = vmatpush1.bf16.msra.mxu1 %v1103_v19  ;;  %999 = vmatprep.subr.bf16.mxu0 %v1139_v46 }
  0x6c   : > { %609 = vmatprep.subr.bf16.mxu1 %v1104_v20 }
  0x6e   : > { %1000 = vmatpush3.bf16.msra.mxu0 %v1140_v47 }
  0x6f   : > { %610 = vmatpush1.bf16.msra.mxu1 %v1106_v21  ;;  %1001 = vmatprep.subr.bf16.mxu0 %v1141_v48 }
  0x70   : > { %611 = vmatprep.subr.bf16.mxu1 %v1107_v22 }
  0x72   : > { %1002 = vmatpush3.bf16.msra.mxu0 %v1142_v6 }
  0x73   : > { %612 = vmatpush1.bf16.msra.mxu1 %v1109_v23  ;;  %1003 = vmatprep.subr.bf16.mxu0 %v1143_v7 }
  0x74   : > { %613 = vmatprep.subr.bf16.mxu1 %v1110_v24 }
  0x76   : > { %1004 = vmatpush3.bf16.msra.mxu0 %v1144_v8 }
  0x77   : > { %614 = vmatpush1.bf16.msra.mxu1 %v1112_v25  ;;  %1005 = vmatprep.subr.bf16.mxu0 %v1145_v9 }
  0x78   : > { %615 = vmatprep.subr.bf16.mxu1 %v1113_v26 }
  0x7a   : > { %1006 = vmatpush3.bf16.msra.mxu0 %v1146_v10 }
  0x7b   : > { %616 = vmatpush1.bf16.msra.mxu1 %v1115_v27 }
  0x7c   : > { %617 = vmatprep.subr.bf16.mxu1 %v1116_v28 }
  0x7f   : > { %618 = vmatpush1.bf16.msra.mxu1 %v1118_v29  ;;  %v968_v29 = vld [vmem:[%s1524_s6] ss:$0 sm:$0xff] }
  0x80   : > { %619 = vmatprep.subr.bf16.mxu1 %v1119_v30 }
  0x83   : > { %620 = vmatpush1.bf16.msra.mxu1 %v1121_v31 }
  0x84   : > { %621 = vmatprep.subr.bf16.mxu1 %v1122_v32 }
  0x87   : > { %622 = vmatpush1.bf16.msra.mxu1 %v1124_v33 }
  0x88   : > { %623 = vmatprep.subr.bf16.mxu1 %v1125_v34 }
  0x8b   : > { %624 = vmatpush1.bf16.msra.mxu1 %v1127_v35 }
  0x8c   : > { %625 = vmatprep.subr.bf16.mxu1 %v1128_v36 }
  0x8f   : > { %626 = vmatpush1.bf16.msra.mxu1 %v1130_v37 }
 0x12c   : > { %v376_v56 = vpop.f32.mrb[0].mxu0 }
 0x12d   : > { %v377_v57 = vadd.f32 %v376_v56, %v321_v54  ;;  %v378_v58 = vpop.f32.mrb[1].mxu0 }
 0x12e   : > { %v379_v59 = vadd.f32 %v378_v58, %v325_v55  ;;  %v380_v60 = vpop.f32.mrb[2].mxu0 }
 0x12f   : > { %v381_v61 = vadd.f32 %v380_v60, %v321_v54  ;;  %v382_v62 = vpop.f32.mrb[3].mxu0  ;;  %v385_v0 = vmax.f32 %v377_v57, 0.0 }
 0x130   : > { %v383_v63 = vadd.f32 %v382_v62, %v325_v55  ;;  %v386_v2 = vmax.f32 %v379_v59, 0.0 }
 0x131   : > { %v387_v1 = vmax.f32 %v381_v61, 0.0 }
 0x132   : > { %v388_v3 = vmax.f32 %v383_v63, 0.0 }
 0x133   : > { %v389_v4 = vpack.c.bf16 %v387_v1, %v385_v0 }
 0x134   : > { %v390_v5 = vpack.c.bf16 %v388_v3, %v386_v2 }
 0x136   : > { %627 = vmatprep.mubr.bf16.mxu1 %v390_v5 }
 0x137   : > { %628 = vmatmul.mubr.bf16.vlgmr.msra.gmra.mrb[0].mxu1 %v389_v4 }
 0x20a   : > { %v629_v14 = vpop.f32.mrb[0].mxu1 }
 0x20b   : > { %v630_v15 = vadd.f32 %v629_v14, %v428_v12  ;;  %v631_v16 = vpop.f32.mrb[1].mxu1 }
 0x20c   : > { %v632_v17 = vadd.f32 %v631_v16, %v432_v13  ;;  %v633_v18 = vpop.f32.mrb[2].mxu1 }
 0x20d   : > { %v634_v19 = vadd.f32 %v633_v18, %v428_v12  ;;  %v635_v20 = vpop.f32.mrb[3].mxu1  ;;  %v638_v22 = vmax.f32 %v630_v15, 0.0 }
 0x20e   : > { %v636_v21 = vadd.f32 %v635_v20, %v432_v13  ;;  %v639_v24 = vmax.f32 %v632_v17, 0.0 }
 0x20f   : > { %v640_v23 = vmax.f32 %v634_v19, 0.0 }
 0x210   : > { %v641_v25 = vmax.f32 %v636_v21, 0.0 }
 0x211   : > { %v642_v26 = vpack.c.bf16 %v640_v23, %v638_v22 }
 0x212   : > { %v643_v27 = vpack.c.bf16 %v641_v25, %v639_v24 }
 0x214   : > { %811 = vmatprep.mubr.bf16.mxu0 %v643_v27 }
 0x215   : > { %812 = vmatmul.mubr.bf16.vlgmr.msra.gmra.mrb[4].mxu0 %v642_v26 }
 0x2e8   : > { %v1007_v28 = vpop.f32.mrb[4].mxu0 }
 0x2e9   : > { %v1008_v30 = vpop.f32.mrb[5].mxu0 }
 0x2ea   : > { %v1009_v31 = vadd.f32 %v1008_v30, %v1007_v28  ;;  %v1010_v32 = vpop.f32.mrb[6].mxu0 }
 0x2eb   : > { %v1011_v33 = vpop.f32.mrb[7].mxu0 }
 0x2ec   : > { %v814_v34 = vadd.f32 %v1009_v31, %v968_v29  ;;  %v1012_v35 = vadd.f32 %v1011_v33, %v1010_v32 }
 0x2ee   : > { %1147 = vtanh.f32 %v814_v34  ;;  %v817_v36 = vadd.f32 %v1012_v35, %v968_v29 }
 0x2f0   : > { %1149 = vtanh.f32 %v817_v36 }
 0x2f8   : > { %v1148_v37 = vpop.eup %1147 }
 0x2f9   : > { %822 = vst [vmem:[%s302_s20] sm:$0xff] %v1148_v37 }
 0x2fa   : > { %v1150_v38 = vpop.eup %1149 }
 0x2fb   : > { %823 = vst [vmem:[%s302_s20 + $0x8] sm:$0xff] %v1150_v38 }
 0x2fc   : > { %1220 = shalt.err (!%p1217_p11)
}
 0x2fd   : > { %s1221_s14 = scalar_lea.hbm %s1473_s29, 256  ;;  %s1225_s16 = scalar_lea.hbm %s1525_s7, 1024 }
 0x2fe   : > { %p1222_p13 = scmp.ne.s32.totalorder %s1473_s29, %s1221_s14  ;;  %p1226_p6 = scmp.lt.u32.totalorder %s1473_s29, %s1525_s7 }
 0x2ff   : > { %p1227_p9 = scmp.lt.u32.totalorder %s1225_s16, %s1221_s14  ;;  %p1229_p10 = scmp.lt.u32.totalorder %s1221_s14, %s1473_s29 }
 0x300   : > { %p1223_p0 = pnand %p1222_p13, %p1539_p1 }
 0x301   : > { %p1228_p12 = por %p1227_p9, %p1226_p6 }
 0x302   : > { %p1224_p5 = pneg %p1223_p0 }
 0x303   : > { %p1230_p2 = por %p1229_p10, %p1228_p12 }
 0x305   : > { %p1231_p3 = pnand %p1230_p2, %p1224_p5 }
 0x307   : > { %1234 = shalt.err (!%p1231_p3)
}
 0x308   : > { %s1287_s20 = smov 128   ;;  %s1288_s22 = smov 8  }
 0x309   : > { %1021 = dma.vmem_to_hbm [thread:$0]  (%p1539_p1), %s1475_s21, 256, %s1473_s29, %s1477_s8, %s1287_s20, %s1287_s20, %s1288_s22  }
 0x30a PF: > { %p1038_p4 = scmp.ge.s32.totalorder %s1277_s27, 2  ;;  %s853_s23 = sand.u32 1, %s1265_s24  }
 0x30b   : > { %p1540_p7 = scmp.ne.s32.totalorder %s1531_s12, 0  ;;  %s854_s9 = scalar_lea.sflag [#allocation4], %s853_s23 }
 0x30d   : > { %p1031_p8 = pnand %p1038_p4, %p1540_p7 }
 0x30f   : > { %1260 = dma.done.wait (!%p1031_p8), %s854_s9, 256  }
 0x310   : > { %1262 = vsyncadd (!%p1031_p8), %s854_s9, 4294967040  ;;  %s1541_s28 = sld [smem:[#allocation11_spill]]  ;;  %p19_p11 = scmp.ge.s32.totalorder %s1354_s30, 6  }
 0x311   : > { %s1542_s24 = smov %s1269_s25  ;;  %s1543_s25 = smov %s1273_s26 }
 0x312   : > { %s1545_s27 = smov %s1354_s30  ;;  %21 = sbr.rel (!%p19_p11) target bundleno = 5 (0x5), region = 92 }
 0x316   : > { %s1544_s26 = smov %s1541_s28 }
 0x319   :  { %859 = vsyncpa [#allocation3], 1 }
 0x31a   :  { %861 = vsyncpa [#allocation3 + $0x1], 1 }
 0x31b   :  { %862 = vsyncpa [#allocation6], 1 }
 0x31c   :  { %863 = vsyncpa [#allocation4], 1 }
 0x31d   :  { %865 = vsyncpa [#allocation4 + $0x1], 1 }

</bundles_post_ra>
